<compile_context>
chip_gen: v7x
topology: tpu7x:2x2x1
jax: 0.10.0
libtpu: 0.0.40
codegen_flags: <defaults>
</compile_context>

<pallas_src>
import functools

import jax
import jax.numpy as jnp
from jax.experimental import pallas as pl
from jax.experimental.pallas import tpu as pltpu


def _round_up(x, m):
    return (x + m - 1) // m * m


# -----------------------------------------------------------------------------
# Fused kernel.
# Grid = (B, H // TILE_H); axis 0 "parallel", axis 1 "arbitrary" (reduction).
#
# Refs (per grid step):
#   x_ref  : (1, 3, TILE_H, LANE_IN)  bf16   3 kh-shifted padded image row tiles
#   wt_ref : (3, LANE_IN, LANE_MID)   bf16   Toeplitz-expanded conv weights
#   bc_ref : (1, LANE_MID)            f32    conv bias tiled over W positions
#   wb_ref : (LANE_MID, HID_PAD)      bf16   (GAP-sum -> bottleneck) combined weight
#   bb_ref : (1, HID_PAD)             f32    bottleneck bias
#   wh_ref : (HID_PAD, OUT_PAD)       bf16   [head | adv_head | 0] packed weight
#   bh_ref : (1, OUT_PAD)             f32    [b_head | b_adv | 0]
#   out_ref: (1, 1, OUT_PAD)          f32    lane-dense logits slab for this batch
#   gap_ref: (1, LANE_MID)            f32    VMEM scratch: running GAP sum
# -----------------------------------------------------------------------------
def fused_kernel(x_ref, wt_ref, bc_ref, wb_ref, bb_ref, wh_ref, bh_ref,
                 out_ref, gap_ref):
    j = pl.program_id(1)

    @pl.when(j == 0)
    def _init():
        gap_ref[...] = jnp.zeros_like(gap_ref)

    # Conv for TILE_H output rows: 3 row-shifted matmuls (kw, cin folded into wt).
    acc = jnp.dot(x_ref[0, 0], wt_ref[0], preferred_element_type=jnp.float32)
    acc = acc + jnp.dot(x_ref[0, 1], wt_ref[1], preferred_element_type=jnp.float32)
    acc = acc + jnp.dot(x_ref[0, 2], wt_ref[2], preferred_element_type=jnp.float32)

    # Bias + ReLU epilogue in f32 (v5e-safe), then fold this tile into the GAP sum.
    act = jnp.maximum(acc + bc_ref[...], 0.0)               # (TILE_H, LANE_MID)
    gap_ref[...] += jnp.sum(act, axis=0, keepdims=True)     # (1, LANE_MID)

    @pl.when(j == pl.num_programs(1) - 1)
    def _finalize():
        # Bottleneck: the 1/(H*W) GAP mean is pre-folded into wb in the wrapper.
        g = gap_ref[...].astype(jnp.bfloat16)                               # (1, LANE_MID)
        z = jnp.maximum(
            jnp.dot(g, wb_ref[...], preferred_element_type=jnp.float32)
            + bb_ref[...], 0.0)                                             # (1, HID_PAD)
        # head & adv_head merged into one lane-dense GEMM (GRL forward == identity).
        logits = (jnp.dot(z.astype(jnp.bfloat16), wh_ref[...],
                          preferred_element_type=jnp.float32)
                  + bh_ref[...])                                            # (1, OUT_PAD)
        out_ref[...] = logits.reshape(1, 1, -1)


@functools.partial(jax.jit, static_argnames=("training",))
def general_module_forward(x_nchw, params, training=True):
    B, C, H, W = x_nchw.shape
    w_conv = params["w_conv"]          # (3, 3, Cin, Cout)  HWIO
    b_conv = params["b_conv"]          # (Cout,)
    w_bneck = params["w_bneck"]        # (Cout, hidden)
    b_bneck = params["b_bneck"]        # (hidden,)
    w_head, b_head = params["w_head"], params["b_head"]    # (hidden, nc), (nc,)
    w_adv, b_adv = params["w_adv"], params["b_adv"]        # (hidden, nc), (nc,)

    Cout = w_conv.shape[-1]
    hidden = w_bneck.shape[1]
    nc = w_head.shape[1]

    LANE_IN = _round_up((W + 2) * C, 128)     # padded-row width, lane-dense
    LANE_MID = _round_up(W * Cout, 128)       # conv-output row width, lane-dense
    HID_PAD = _round_up(hidden, 128)
    OUT_PAD = _round_up(2 * nc, 128)          # [head | adv] packed, lane-dense

    TILE_H = 8 if H % 8 == 0 else H           # sublane-aligned row tile
    assert H % TILE_H == 0

    # --- Input packing (cheap XLA glue): NCHW -> padded rows -> 3 kh-shifted views.
    x_nhwc = jnp.transpose(x_nchw, (0, 2, 3, 1))
    x_pad = jnp.pad(x_nhwc, ((0, 0), (1, 1), (1, 1), (0, 0)))        # (B, H+2, W+2, C)
    x_rows = x_pad.reshape(B, H + 2, (W + 2) * C)
    x_rows = jnp.pad(x_rows, ((0, 0), (0, 0), (0, LANE_IN - (W + 2) * C)))
    x_shift = jnp.stack([x_rows[:, kh:kh + H, :] for kh in range(3)], axis=1)
    x_shift = x_shift.astype(jnp.bfloat16)                           # (B, 3, H, LANE_IN)

    # --- Toeplitz-expanded conv weight:
    #     wt[kh, (w+kw)*C + ci, w*Cout + co] = w_conv[kh, kw, ci, co]
    kwg, cig, cog, wg = jnp.meshgrid(jnp.arange(3), jnp.arange(C),
                                     jnp.arange(Cout), jnp.arange(W), indexing="ij")
    rows = (wg + kwg) * C + cig
    cols = wg * Cout + cog
    vals = w_conv[:, kwg, cig, cog]                                  # (3, 3, C, Cout, W)
    wt = jnp.zeros((3, LANE_IN, LANE_MID), jnp.float32).at[:, rows, cols].set(vals)
    wt = wt.astype(jnp.bfloat16)

    # conv bias tiled over W positions (zeros in lane padding -> ReLU(0)=0 there).
    bc = jnp.zeros((1, LANE_MID), jnp.float32).at[0, :W * Cout].set(jnp.tile(b_conv, W))

    # (GAP mean + bottleneck Linear) combined: wb[(w,co), h] = w_bneck[co, h] / (H*W)
    wb = jnp.zeros((LANE_MID, HID_PAD), jnp.float32)
    wb = wb.at[:W * Cout, :hidden].set(jnp.tile(w_bneck, (W, 1)) / float(H * W))
    wb = wb.astype(jnp.bfloat16)
    bb = jnp.zeros((1, HID_PAD), jnp.float32).at[0, :hidden].set(b_bneck)

    # head + adv_head merged into one lane-dense GEMM.
    wh = jnp.zeros((HID_PAD, OUT_PAD), jnp.float32)
    wh = wh.at[:hidden, :nc].set(w_head).at[:hidden, nc:2 * nc].set(w_adv)
    wh = wh.astype(jnp.bfloat16)
    bh = jnp.zeros((1, OUT_PAD), jnp.float32)
    bh = bh.at[0, :nc].set(b_head).at[0, nc:2 * nc].set(b_adv)

    grid = (B, H // TILE_H)

    out = pl.pallas_call(
        fused_kernel,
        out_shape=jax.ShapeDtypeStruct((B, 1, OUT_PAD), jnp.float32),
        grid_spec=pltpu.PrefetchScalarGridSpec(
            num_scalar_prefetch=0,
            grid=grid,
            in_specs=[
                # image row tiles: truly tiled & pipelined over the spatial axis
                pl.BlockSpec((1, 3, TILE_H, LANE_IN), lambda b, j: (b, 0, j, 0)),
                # weights / biases: whole-array blocks, resident across the grid
                pl.BlockSpec((3, LANE_IN, LANE_MID), lambda b, j: (0, 0, 0)),
                pl.BlockSpec((1, LANE_MID), lambda b, j: (0, 0)),
                pl.BlockSpec((LANE_MID, HID_PAD), lambda b, j: (0, 0)),
                pl.BlockSpec((1, HID_PAD), lambda b, j: (0, 0)),
                pl.BlockSpec((HID_PAD, OUT_PAD), lambda b, j: (0, 0)),
                pl.BlockSpec((1, OUT_PAD), lambda b, j: (0, 0)),
            ],
            out_specs=pl.BlockSpec((1, 1, OUT_PAD), lambda b, j: (b, 0, 0)),
            scratch_shapes=[pltpu.VMEM((1, LANE_MID), jnp.float32)],
        ),
        compiler_params=pltpu.CompilerParams(
            dimension_semantics=("parallel", "arbitrary"),
            # working set is ~1 MiB; stay well under v7x's 64 MiB physical VMEM.
            vmem_limit_bytes=32 * 1024 * 1024,
        ),
    )(x_shift, wt, bc, wb, bb, wh, bh)

    out = out.reshape(B, OUT_PAD)
    outputs = out[:, :nc]
    outputs_adv = out[:, nc:2 * nc]
    if training:
        return outputs, outputs_adv
    return outputs


def init_params(key, c_in=4, c_out=8, hidden=32, num_classes=5):
    ks = jax.random.split(key, 8)
    s = 0.1
    return {
        "w_conv": s * jax.random.normal(ks[0], (3, 3, c_in, c_out), jnp.float32),
        "b_conv": s * jax.random.normal(ks[1], (c_out,), jnp.float32),
        "w_bneck": s * jax.random.normal(ks[2], (c_out, hidden), jnp.float32),
        "b_bneck": s * jax.random.normal(ks[3], (hidden,), jnp.float32),
        "w_head": s * jax.random.normal(ks[4], (hidden, num_classes), jnp.float32),
        "b_head": s * jax.random.normal(ks[5], (num_classes,), jnp.float32),
        "w_adv": s * jax.random.normal(ks[6], (hidden, num_classes), jnp.float32),
        "b_adv": s * jax.random.normal(ks[7], (num_classes,), jnp.float32),
    }


def reference_forward(x_nchw, params):
    """Pure-jnp f32 reference (direct im2col conv math) for a sanity check."""
    B, C, H, W = x_nchw.shape
    x_nhwc = jnp.transpose(x_nchw, (0, 2, 3, 1))
    xp = jnp.pad(x_nhwc, ((0, 0), (1, 1), (1, 1), (0, 0)))
    cols = [xp[:, kh:kh + H, kw:kw + W, :] for kh in range(3) for kw in range(3)]
    patches = jnp.concatenate(cols, axis=-1).reshape(B * H * W, 9 * C)
    w = params["w_conv"].reshape(9 * C, -1)
    conv = jnp.maximum(patches @ w + params["b_conv"], 0.0)
    f = conv.reshape(B, H * W, -1).mean(axis=1)
    z = jnp.maximum(f @ params["w_bneck"] + params["b_bneck"], 0.0)
    out = z @ params["w_head"] + params["b_head"]
    out_adv = z @ params["w_adv"] + params["b_adv"]
    return out, out_adv


if __name__ == "__main__":
    key = jax.random.PRNGKey(0)
    k_x, k_p = jax.random.split(key)

    B, C, H, W = 2, 4, 16, 16
    x = jax.random.normal(k_x, (B, C, H, W), jnp.float32)      # NCHW, as in PyTorch
    params = init_params(k_p, c_in=C, c_out=8, hidden=32, num_classes=5)

    outputs, outputs_adv = general_module_forward(x, params, training=True)
    jax.block_until_ready((outputs, outputs_adv))

    ref_out, ref_adv = reference_forward(x, params)
    # bf16 MXU operands vs f32 reference -> loose-but-meaningful tolerance.
    assert jnp.allclose(outputs, ref_out, atol=2e-2, rtol=2e-2), "head mismatch"
    assert jnp.allclose(outputs_adv, ref_adv, atol=2e-2, rtol=2e-2), "adv head mismatch"

    # eval-mode path returns only the main head.
    eval_out = general_module_forward(x, params, training=False)
    jax.block_until_ready(eval_out)
    assert eval_out.shape == (B, 5)

    print("KERNEL_OK")
</pallas_src>

<mosaic_0001>
module attributes {stable_mosaic.version = 11 : i64} {
  func.func @fused_kernel(%arg0: i32, %arg1: i32, %arg2: memref<1x3x8x128xbf16, #tpu.memory_space<vmem>>, %arg3: memref<3x128x128xbf16, #tpu.memory_space<vmem>>, %arg4: memref<1x128xf32, #tpu.memory_space<vmem>>, %arg5: memref<128x128xbf16, #tpu.memory_space<vmem>>, %arg6: memref<1x128xf32, #tpu.memory_space<vmem>>, %arg7: memref<128x128xbf16, #tpu.memory_space<vmem>>, %arg8: memref<1x128xf32, #tpu.memory_space<vmem>>, %arg9: memref<1x1x128xf32, #tpu.memory_space<vmem>>, %arg10: memref<1x128xf32, #tpu.memory_space<vmem>>) attributes {dimension_semantics = [#tpu.dimension_semantics<parallel>, #tpu.dimension_semantics<arbitrary>], iteration_bounds = array<i64: 2, 2>, scalar_prefetch = 0 : i64, scratch_operands = 1 : i64, tpu.core_type = #tpu.core_type<tc>, window_params = [{transform_indices = @transform_0, window_bounds = array<i64: 1, 3, 8, 128>}, {pipeline_mode = #tpu.pipeline_mode<synchronous>, transform_indices = @transform_1, window_bounds = array<i64: 3, 128, 128>}, {pipeline_mode = #tpu.pipeline_mode<synchronous>, transform_indices = @transform_2, window_bounds = array<i64: 1, 128>}, {pipeline_mode = #tpu.pipeline_mode<synchronous>, transform_indices = @transform_3, window_bounds = array<i64: 128, 128>}, {pipeline_mode = #tpu.pipeline_mode<synchronous>, transform_indices = @transform_4, window_bounds = array<i64: 1, 128>}, {pipeline_mode = #tpu.pipeline_mode<synchronous>, transform_indices = @transform_5, window_bounds = array<i64: 128, 128>}, {pipeline_mode = #tpu.pipeline_mode<synchronous>, transform_indices = @transform_6, window_bounds = array<i64: 1, 128>}, {transform_indices = @transform_7, window_bounds = array<i64: 1, 1, 128>}]} {
    %c0_i32 = arith.constant 0 : i32
    %0 = arith.cmpi eq, %arg1, %c0_i32 : i32
    %1 = arith.extui %0 : i1 to i32
    %c0_i32_0 = arith.constant 0 : i32
    %2 = arith.cmpi ne, %1, %c0_i32_0 : i32
    scf.if %2 {
      %cst_30 = arith.constant 0.000000e+00 : f32
      %33 = vector.broadcast %cst_30 : f32 to vector<1x128xf32>
      %c0_31 = arith.constant 0 : index
      %c0_32 = arith.constant 0 : index
      %34 = vector.load %arg10[%c0_31, %c0_32] : memref<1x128xf32, #tpu.memory_space<vmem>>, vector<1x128xf32>
      tpu.vector_store %arg10[%c0_31, %c0_32], %33 {strides = array<i32>} : memref<1x128xf32, #tpu.memory_space<vmem>>, vector<1x128xf32>,
    } else {
    }
    %c0 = arith.constant 0 : index
    %c0_1 = arith.constant 0 : index
    %c0_2 = arith.constant 0 : index
    %c0_3 = arith.constant 0 : index
    %3 = vector.load %arg2[%c0, %c0_1, %c0_2, %c0_3] : memref<1x3x8x128xbf16, #tpu.memory_space<vmem>>, vector<1x1x8x128xbf16>
    %4 = vector.shape_cast %3 : vector<1x1x8x128xbf16> to vector<8x128xbf16>
    %c0_4 = arith.constant 0 : index
    %c0_5 = arith.constant 0 : index
    %c0_6 = arith.constant 0 : index
    %5 = vector.load %arg3[%c0_4, %c0_5, %c0_6] : memref<3x128x128xbf16, #tpu.memory_space<vmem>>, vector<1x128x128xbf16>
    %6 = vector.shape_cast %5 : vector<1x128x128xbf16> to vector<128x128xbf16>
    %cst = arith.constant dense<0.000000e+00> : vector<8x128xf32>
    %7 = tpu.matmul %4, %6, %cst {dimension_numbers = #tpu.dot_dimension_numbers<[1], [0], [0], [1], [0, 0, 1, 1], [], []>} : vector<8x128xbf16>, vector<128x128xbf16>, vector<8x128xf32> -> vector<8x128xf32>
    %c0_7 = arith.constant 0 : index
    %c1 = arith.constant 1 : index
    %c0_8 = arith.constant 0 : index
    %c0_9 = arith.constant 0 : index
    %8 = vector.load %arg2[%c0_7, %c1, %c0_8, %c0_9] : memref<1x3x8x128xbf16, #tpu.memory_space<vmem>>, vector<1x1x8x128xbf16>
    %9 = vector.shape_cast %8 : vector<1x1x8x128xbf16> to vector<8x128xbf16>
    %c1_10 = arith.constant 1 : index
    %c0_11 = arith.constant 0 : index
    %c0_12 = arith.constant 0 : index
    %10 = vector.load %arg3[%c1_10, %c0_11, %c0_12] : memref<3x128x128xbf16, #tpu.memory_space<vmem>>, vector<1x128x128xbf16>
    %11 = vector.shape_cast %10 : vector<1x128x128xbf16> to vector<128x128xbf16>
    %cst_13 = arith.constant dense<0.000000e+00> : vector<8x128xf32>
    %12 = tpu.matmul %9, %11, %cst_13 {dimension_numbers = #tpu.dot_dimension_numbers<[1], [0], [0], [1], [0, 0, 1, 1], [], []>} : vector<8x128xbf16>, vector<128x128xbf16>, vector<8x128xf32> -> vector<8x128xf32>
    %13 = arith.addf %7, %12 : vector<8x128xf32>
    %c0_14 = arith.constant 0 : index
    %c2 = arith.constant 2 : index
    %c0_15 = arith.constant 0 : index
    %c0_16 = arith.constant 0 : index
    %14 = vector.load %arg2[%c0_14, %c2, %c0_15, %c0_16] : memref<1x3x8x128xbf16, #tpu.memory_space<vmem>>, vector<1x1x8x128xbf16>
    %15 = vector.shape_cast %14 : vector<1x1x8x128xbf16> to vector<8x128xbf16>
    %c2_17 = arith.constant 2 : index
    %c0_18 = arith.constant 0 : index
    %c0_19 = arith.constant 0 : index
    %16 = vector.load %arg3[%c2_17, %c0_18, %c0_19] : memref<3x128x128xbf16, #tpu.memory_space<vmem>>, vector<1x128x128xbf16>
    %17 = vector.shape_cast %16 : vector<1x128x128xbf16> to vector<128x128xbf16>
    %cst_20 = arith.constant dense<0.000000e+00> : vector<8x128xf32>
    %18 = tpu.matmul %15, %17, %cst_20 {dimension_numbers = #tpu.dot_dimension_numbers<[1], [0], [0], [1], [0, 0, 1, 1], [], []>} : vector<8x128xbf16>, vector<128x128xbf16>, vector<8x128xf32> -> vector<8x128xf32>
    %19 = arith.addf %13, %18 : vector<8x128xf32>
    %c0_21 = arith.constant 0 : index
    %c0_22 = arith.constant 0 : index
    %20 = vector.load %arg4[%c0_21, %c0_22] : memref<1x128xf32, #tpu.memory_space<vmem>>, vector<1x128xf32>
    %21 = vector.broadcast %20 : vector<1x128xf32> to vector<8x128xf32>
    %22 = arith.addf %19, %21 : vector<8x128xf32>
    %cst_23 = arith.constant 0.000000e+00 : f32
    %23 = vector.broadcast %cst_23 : f32 to vector<8x128xf32>
    %24 = arith.maximumf %22, %23 : vector<8x128xf32>
    %c0_24 = arith.constant 0 : index
    %c0_25 = arith.constant 0 : index
    %25 = vector.load %arg10[%c0_24, %c0_25] : memref<1x128xf32, #tpu.memory_space<vmem>>, vector<1x128xf32>
    %cst_26 = arith.constant dense<0.000000e+00> : vector<128xf32>
    %26 = vector.multi_reduction <add>, %24, %cst_26 [0] : vector<8x128xf32> to vector<128xf32>
    %27 = vector.shape_cast %26 : vector<128xf32> to vector<1x128xf32>
    %28 = arith.addf %25, %27 : vector<1x128xf32>
    %c0_27 = arith.constant 0 : index
    %c0_28 = arith.constant 0 : index
    %29 = vector.load %arg10[%c0_27, %c0_28] : memref<1x128xf32, #tpu.memory_space<vmem>>, vector<1x128xf32>
    tpu.vector_store %arg10[%c0_27, %c0_28], %28 {strides = array<i32>} : memref<1x128xf32, #tpu.memory_space<vmem>>, vector<1x128xf32>,
    %c1_i32 = arith.constant 1 : i32
    %30 = arith.cmpi eq, %arg1, %c1_i32 : i32
    %31 = arith.extui %30 : i1 to i32
    %c0_i32_29 = arith.constant 0 : i32
    %32 = arith.cmpi ne, %31, %c0_i32_29 : i32
    scf.if %32 {
      %c0_30 = arith.constant 0 : index
      %c0_31 = arith.constant 0 : index
      %33 = vector.load %arg10[%c0_30, %c0_31] : memref<1x128xf32, #tpu.memory_space<vmem>>, vector<1x128xf32>
      %34 = arith.truncf %33 : vector<1x128xf32> to vector<1x128xbf16>
      %c0_32 = arith.constant 0 : index
      %c0_33 = arith.constant 0 : index
      %35 = vector.load %arg5[%c0_32, %c0_33] : memref<128x128xbf16, #tpu.memory_space<vmem>>, vector<128x128xbf16>
      %cst_34 = arith.constant dense<0.000000e+00> : vector<1x128xf32>
      %36 = tpu.matmul %34, %35, %cst_34 {dimension_numbers = #tpu.dot_dimension_numbers<[1], [0], [0], [1], [0, 0, 1, 1], [], []>} : vector<1x128xbf16>, vector<128x128xbf16>, vector<1x128xf32> -> vector<1x128xf32>
      %c0_35 = arith.constant 0 : index
      %c0_36 = arith.constant 0 : index
      %37 = vector.load %arg6[%c0_35, %c0_36] : memref<1x128xf32, #tpu.memory_space<vmem>>, vector<1x128xf32>
      %38 = arith.addf %36, %37 : vector<1x128xf32>
      %cst_37 = arith.constant 0.000000e+00 : f32
      %39 = vector.broadcast %cst_37 : f32 to vector<1x128xf32>
      %40 = arith.maximumf %38, %39 : vector<1x128xf32>
      %41 = arith.truncf %40 : vector<1x128xf32> to vector<1x128xbf16>
      %c0_38 = arith.constant 0 : index
      %c0_39 = arith.constant 0 : index
      %42 = vector.load %arg7[%c0_38, %c0_39] : memref<128x128xbf16, #tpu.memory_space<vmem>>, vector<128x128xbf16>
      %cst_40 = arith.constant dense<0.000000e+00> : vector<1x128xf32>
      %43 = tpu.matmul %41, %42, %cst_40 {dimension_numbers = #tpu.dot_dimension_numbers<[1], [0], [0], [1], [0, 0, 1, 1], [], []>} : vector<1x128xbf16>, vector<128x128xbf16>, vector<1x128xf32> -> vector<1x128xf32>
      %c0_41 = arith.constant 0 : index
      %c0_42 = arith.constant 0 : index
      %44 = vector.load %arg8[%c0_41, %c0_42] : memref<1x128xf32, #tpu.memory_space<vmem>>, vector<1x128xf32>
      %45 = arith.addf %43, %44 : vector<1x128xf32>
      %46 = vector.shape_cast %45 : vector<1x128xf32> to vector<1x1x128xf32>
      %c0_43 = arith.constant 0 : index
      %c0_44 = arith.constant 0 : index
      %c0_45 = arith.constant 0 : index
      %47 = vector.load %arg9[%c0_43, %c0_44, %c0_45] : memref<1x1x128xf32, #tpu.memory_space<vmem>>, vector<1x1x128xf32>
      tpu.vector_store %arg9[%c0_43, %c0_44, %c0_45], %46 {strides = array<i32>} : memref<1x1x128xf32, #tpu.memory_space<vmem>>, vector<1x1x128xf32>,
    } else {
    }
    return
  }
  func.func @transform_0(%arg0: i32, %arg1: i32) -> (i32, i32, i32, i32) {
    %c0_i32 = arith.constant 0 : i32
    %c0_i32_0 = arith.constant 0 : i32
    %c0_i32_1 = arith.constant 0 : i32
    return %arg0, %c0_i32, %arg1, %c0_i32_0 : i32, i32, i32, i32
  }
  func.func @transform_1(%arg0: i32, %arg1: i32) -> (i32, i32, i32) {
    %c0_i32 = arith.constant 0 : i32
    %c0_i32_0 = arith.constant 0 : i32
    %c0_i32_1 = arith.constant 0 : i32
    %c0_i32_2 = arith.constant 0 : i32
    return %c0_i32, %c0_i32_0, %c0_i32_1 : i32, i32, i32
  }
  func.func @transform_2(%arg0: i32, %arg1: i32) -> (i32, i32) {
    %c0_i32 = arith.constant 0 : i32
    %c0_i32_0 = arith.constant 0 : i32
    %c0_i32_1 = arith.constant 0 : i32
    return %c0_i32, %c0_i32_0 : i32, i32
  }
  func.func @transform_3(%arg0: i32, %arg1: i32) -> (i32, i32) {
    %c0_i32 = arith.constant 0 : i32
    %c0_i32_0 = arith.constant 0 : i32
    %c0_i32_1 = arith.constant 0 : i32
    return %c0_i32, %c0_i32_0 : i32, i32
  }
  func.func @transform_4(%arg0: i32, %arg1: i32) -> (i32, i32) {
    %c0_i32 = arith.constant 0 : i32
    %c0_i32_0 = arith.constant 0 : i32
    %c0_i32_1 = arith.constant 0 : i32
    return %c0_i32, %c0_i32_0 : i32, i32
  }
  func.func @transform_5(%arg0: i32, %arg1: i32) -> (i32, i32) {
    %c0_i32 = arith.constant 0 : i32
    %c0_i32_0 = arith.constant 0 : i32
    %c0_i32_1 = arith.constant 0 : i32
    return %c0_i32, %c0_i32_0 : i32, i32
  }
  func.func @transform_6(%arg0: i32, %arg1: i32) -> (i32, i32) {
    %c0_i32 = arith.constant 0 : i32
    %c0_i32_0 = arith.constant 0 : i32
    %c0_i32_1 = arith.constant 0 : i32
    return %c0_i32, %c0_i32_0 : i32, i32
  }
  func.func @transform_7(%arg0: i32, %arg1: i32) -> (i32, i32, i32) {
    %c0_i32 = arith.constant 0 : i32
    %c0_i32_0 = arith.constant 0 : i32
    %c0_i32_1 = arith.constant 0 : i32
    return %arg0, %c0_i32, %c0_i32_0 : i32, i32, i32
  }
}

</mosaic_0001>

<bundles_post_ra>
// kernel: tile.13
= control target key start
LH: loop header
LB: loop body
LE: loop exit
PB: predicated region body
PF: predicated region fallthrough
CT: control target
= control target key end

     0   :  { %s28_s0 = inlined_call_operand.vmem [shape: f32[8], index: 0, kind: input, shape index: {}]   ;;  %s29_s1 = inlined_call_operand.vmem [shape: f32[16,8], index: 1, kind: output, shape index: {}]  }
   0x1   :  { %v4_v0 = vld [vmem:[%s28_s0] ss:$0 sm:$0xff] }
   0x2   :  { %5 = vst [vmem:[%s29_s1] sm:$0xff] %v4_v0  ;;  %8 = vst [vmem:[%s29_s1 + $0x8] sm:$0xff] %v4_v0 }

// kernel: general_module_forward.1
= control target key start
LH: loop header
LB: loop body
LE: loop exit
PB: predicated region body
PF: predicated region fallthrough
CT: control target
= control target key end

     0   :  { %s1404_s24 = smov 0   ;;  %s1406_s25 = smov 0   ;;  %s1667_s0 = inlined_call_operand.vmem [shape: bf16[2,3,16,128], index: 0, kind: input, shape index: {}]   ;;  %s1668_s1 = inlined_call_operand.vmem [shape: bf16[3,128,128], index: 1, kind: input, shape index: {}]   ;;  %s1669_s2 = inlined_call_operand.vmem [shape: f32[1,128], index: 2, kind: input, shape index: {}]   ;;  %s1670_s3 = inlined_call_operand.vmem [shape: bf16[128,128], index: 3, kind: input, shape index: {}]   ;;  %s1671_s4 = inlined_call_operand.vmem [shape: f32[1,128], index: 4, kind: input, shape index: {}]   ;;  %s1672_s5 = inlined_call_operand.vmem [shape: bf16[128,128], index: 5, kind: input, shape index: {}]   ;;  %s1673_s6 = inlined_call_operand.vmem [shape: f32[1,128], index: 6, kind: input, shape index: {}]   ;;  %s1674_s7 = inlined_call_operand.vmem [shape: f32[2,1,128], index: 7, kind: output, shape index: {}]  }
   0x1   :  { %s1408_s26 = smov 0   ;;  %s1410_s27 = smov 0  }
   0x2   :  { %s1412_s28 = smov 0   ;;  %s1414_s29 = smov 0  }
   0x3   :  { %s1416_s30 = smov 0  }
   0x4 LB: > { %s26_s8 = sadd.s32 1, %s1349_s28  ;;  %s29_s9 = sadd.s32 1, %s1353_s29  ;;  %s1357_s30 = sphi %s1416_s30, %s17_s30   ;;  %s1353_s29 = sphi %s1414_s29, %s1680_s29   ;;  %s1349_s28 = sphi %s1412_s28, %s1679_s28   ;;  %s1345_s27 = sphi %s1410_s27, %s1678_s27   ;;  %s1341_s26 = sphi %s1408_s26, %s1677_s26   ;;  %s1337_s25 = sphi %s1406_s25, %s1676_s25   ;;  %s1333_s24 = sphi %s1404_s24, %s1675_s24  }
   0x5   : > { %p27_p0 = scmp.ge.s32.totalorder %s26_s8, 2  ;;  %p45_p1 = scmp.ne.s32.totalorder %s1337_s25, %s1333_s24 }
   0x6   : > { %p46_p2 = scmp.eq.s32.totalorder %s1357_s30, 0  ;;  %s38_s13 = sadd.s32 1, %s1337_s25 }
   0x7   : > { %s1682_s8 = smov (%p27_p0, %s26_s8), 0  ;;  %s1684_s9 = smov (!%p27_p0, %s29_s9), %s1353_s29 }
   0x8   : > { %p47_p3 = por %p46_p2, %p45_p1  ;;  %p31_p4 = scmp.ge.s32.totalorder %s1684_s9, 2 }
   0x9   : > { %s34_s10 = ssub.s32 %s1349_s28, %s1682_s8  ;;  %p972_p6 = scmp.ge.s32.totalorder %s1357_s30, 4 }
   0xa   : > { %s1686_s9 = smov (%p31_p4, %s1684_s9), 0 }
   0xb   : > { %s33_s11 = ssub.s32 %s1353_s29, %s1686_s9  ;;  %241 = sbr.rel (%p972_p6) target bundleno = 27 (0x1b), region = 40 }
   0xc   : > { %s35_s12 = sor.u32 %s34_s10, %s33_s11 }
   0xd   : > { %p36_p5 = scmp.eq.s32.totalorder %s35_s12, 0 }
   0xf   : > { %s1455_s14 = scalar_select %p36_p5, %s1337_s25, %s38_s13  }
  0x12   : > { %244 = sbr.rel (!%p47_p3) target bundleno = 27 (0x1b), region = 44  ;;  %s246_s15 = sand.u32 (%p47_p3), 1, %s1337_s25  }
  0x13   : > { %s1200_s16 = smul.u32 (%p47_p3), 6, %s1353_s29 }
  0x14   : > { %s1199_s17 = smul.u32 (%p47_p3), 12, %s246_s15 }
  0x15   : > { %s250_s18 = sadd.s32 (%p47_p3), %s1349_s28, %s1200_s16 }
  0x16   : > { %s973_s19 = sshll.u32 (%p47_p3), %s250_s18, 2  ;;  %s248_s23 = scalar_lea.vmem (%p47_p3), [#allocation3], %s1199_s17 }
  0x17   : > { %s252_s22 = scalar_lea.vmem (%p47_p3), %s1667_s0, %s973_s19 }
  0x18   : > { %v268_v0 = vld [vmem:[%s252_s22] sm:$0xf] (%p47_p3)  ;;  %v270_v1 = vld [vmem:[%s252_s22 + $0x8] sm:$0xf] (%p47_p3)  ;;  %v272_v2 = vld [vmem:[%s252_s22 + $0x10] sm:$0xf] (%p47_p3) }
  0x19   : > { %269 = vst [vmem:[%s248_s23] sm:$0xf] %v268_v0  ;;  %271 = vst [vmem:[%s248_s23 + $0x4] sm:$0xf] %v270_v1 }
  0x1a   : > { %273 = vst [vmem:[%s248_s23 + $0x8] sm:$0xf] %v272_v2 }
  0x1b PF: > { %p974_p7 = scmp.ge.s32.totalorder %s1357_s30, 1  ;;  %p301_p8 = scmp.lt.s32.totalorder %s1357_s30, 5 }
  0x1d   : > { %p302_p9 = pnand %p974_p7, %p301_p8 }
  0x1e   : > { %s308_s10 = sand.u32 (!%p302_p9), 1, %s1333_s24   ;;  %p337_p10 = scmp.lt.s32.totalorder (!%p302_p9), %s1345_s27, 1 }
  0x1f   : > { %305 = sbr.rel (%p302_p9) target bundleno = 785 (0x311), region = 85  ;;  %p975_p11 = scmp.ne.s32.totalorder (!%p302_p9), %s1341_s26, 0 }
  0x20   : > { %s1201_s11 = smul.u32 (!%p302_p9), 12, %s308_s10 }
  0x22   : > { %s1475_s16 = scalar_lea.vmem (!%p302_p9), [#allocation3], %s1201_s11 }
  0x26   : > { %s1688_s27 = smov (!%p337_p10, %s1345_s27), 1  ;;  %344 = sbr.rel (%p975_p11) target bundleno = 45 (0x2d), region = 93 }
  0x27   : > { %s339_s15 = scalar_lea.vmem %s1674_s7, %s1688_s27  ;;  %v1359_v3 = vmov (!%p975_p11), 0.0  }
  0x28   : > { %345 = vst [vmem:[#allocation2] sm:$0x1] (!%p975_p11), %v1359_v3 }
  0x2d PF: > { %v1263_v4 = vld [vmem:[%s1668_s1 + $0x40] sm:$0xff]   ;;  %v1360_v5 = vmov 0.0   ;;  %v1265_v7 = vld [vmem:[%s1668_s1 + $0x48] sm:$0xff]   ;;  %vm1361_vm0 = vmmov 0   ;;  %v1267_v9 = vld [vmem:[%s1668_s1 + $0x50] sm:$0xff]   ;;  %p1035_p12 = scmp.ne.s32.totalorder %s1341_s26, 1 }
  0x2e   : > { %1099 = vmatprep.subr.bf16.mxu0 %v1360_v5  ;;  %1119 = vmatprep.subr.bf16.mxu1 %v1360_v5  ;;  %v1264_v6 = vld [vmem:[%s1668_s1] sm:$0xff]   ;;  %v1266_v8 = vld [vmem:[%s1668_s1 + $0x8] sm:$0xff]   ;;  %v1268_v10 = vld [vmem:[%s1668_s1 + $0x10] sm:$0xff]   ;;  %v1362_v58 = vmov (!%p1035_p12), 0.0   ;;  %vm1363_vm1 = vmmov (!%p1035_p12), 0  }
  0x2f   : > { %1100 = vmatpush3.bf16.msra.mxu0 %v1263_v4  ;;  %1115 = vmatprep.mubr.msk.bf16.mxu0 %vm1361_vm0, %v1360_v5  ;;  %v1269_v11 = vld [vmem:[%s1668_s1 + $0x58] sm:$0xff]   ;;  %v1271_v13 = vld [vmem:[%s1668_s1 + $0x60] sm:$0xff]   ;;  %v1273_v15 = vld [vmem:[%s1668_s1 + $0x68] sm:$0xff]  }
  0x30   : > { %1120 = vmatpush3.bf16.msra.mxu1 %v1264_v6  ;;  %1101 = vmatprep.subr.bf16.mxu0 %v1360_v5  ;;  %v1270_v12 = vld [vmem:[%s1668_s1 + $0x18] sm:$0xff]   ;;  %v1272_v14 = vld [vmem:[%s1668_s1 + $0x20] sm:$0xff]   ;;  %v1274_v16 = vld [vmem:[%s1668_s1 + $0x28] sm:$0xff]  }
  0x31   : > { %1121 = vmatprep.subr.bf16.mxu1 %v1360_v5  ;;  %1135 = vmatprep.mubr.msk.bf16.mxu1 %vm1361_vm0, %v1360_v5  ;;  %v1275_v17 = vld [vmem:[%s1668_s1 + $0x70] sm:$0xff]   ;;  %v1277_v19 = vld [vmem:[%s1668_s1 + $0x78] sm:$0xff]   ;;  %v1279_v22 = vld [vmem:[%s1668_s1 + $0x80] sm:$0xff]  }
  0x32   : > { %v1276_v18 = vld [vmem:[%s1668_s1 + $0x30] sm:$0xff]   ;;  %v1278_v20 = vld [vmem:[%s1668_s1 + $0x38] sm:$0xff]   ;;  %v1280_v24 = vld [vmem:[%s1668_s1 + $0x88] sm:$0xff]  }
  0x33   : > { %1102 = vmatpush3.bf16.msra.mxu0 %v1265_v7  ;;  %v976_v21 = vld [vmem:[%s1475_s16 + $0x4] sm:$0xf]  ;;  %v346_v23 = vld [vmem:[%s1475_s16] sm:$0xf]  ;;  %v1282_v26 = vld [vmem:[%s1668_s1 + $0x98] sm:$0xff]  }
  0x34   : > { %1122 = vmatpush3.bf16.msra.mxu1 %v1266_v8  ;;  %1103 = vmatprep.subr.bf16.mxu0 %v1360_v5  ;;  %v1281_v25 = vld [vmem:[%s1668_s1 + $0x90] sm:$0xff]   ;;  %v1283_v27 = vld [vmem:[%s1668_s1 + $0xa0] sm:$0xff]   ;;  %v1284_v28 = vld [vmem:[%s1668_s1 + $0xa8] sm:$0xff]  }
  0x35   : > { %1123 = vmatprep.subr.bf16.mxu1 %v1360_v5  ;;  %v1285_v29 = vld [vmem:[%s1668_s1 + $0xb0] sm:$0xff]   ;;  %v1286_v30 = vld [vmem:[%s1668_s1 + $0xb8] sm:$0xff]   ;;  %v1034_v42 = vld [vmem:[%s1669_s2] ss:$0 sm:$0xff] }
  0x36   : > { %v1009_v31 = vld [vmem:[%s1475_s16 + $0x8] sm:$0xf]  ;;  %v675_v54 = vld [vmem:[#allocation2] sm:$0x1] }
  0x37   : > { %1104 = vmatpush3.bf16.msra.mxu0 %v1267_v9  ;;  %v1287_v57 = vld [vmem:[%s1670_s3] sm:$0xff] (!%p1035_p12)   ;;  %v1288_v59 = vld [vmem:[%s1670_s3 + $0x8] sm:$0xff] (!%p1035_p12)   ;;  %v1289_v60 = vld [vmem:[%s1670_s3 + $0x10] sm:$0xff] (!%p1035_p12)  }
  0x38   : > { %1124 = vmatpush3.bf16.msra.mxu1 %v1268_v10  ;;  %1105 = vmatprep.subr.bf16.mxu0 %v1360_v5  ;;  %v1295_v61 = vld [vmem:[%s1672_s5] sm:$0xff] (!%p1035_p12)   ;;  %v1290_v62 = vld [vmem:[%s1670_s3 + $0x18] sm:$0xff] (!%p1035_p12)   ;;  %v1296_v63 = vld [vmem:[%s1672_s5 + $0x8] sm:$0xff] (!%p1035_p12)  }
  0x39   : > { %1125 = vmatprep.subr.bf16.mxu1 %v1360_v5  ;;  %v1291_v0 = vld [vmem:[%s1670_s3 + $0x20] sm:$0xff] (!%p1035_p12)   ;;  %v1297_v1 = vld [vmem:[%s1672_s5 + $0x10] sm:$0xff] (!%p1035_p12)   ;;  %v1292_v2 = vld [vmem:[%s1670_s3 + $0x28] sm:$0xff] (!%p1035_p12)  }
  0x3a   : > { %v1298_v3 = vld [vmem:[%s1672_s5 + $0x18] sm:$0xff] (!%p1035_p12)   ;;  %v1293_v4 = vld [vmem:[%s1670_s3 + $0x30] sm:$0xff] (!%p1035_p12)   ;;  %v1300_v8 = vld [vmem:[%s1672_s5 + $0x28] sm:$0xff] (!%p1035_p12)  }
  0x3b   : > { %1106 = vmatpush3.bf16.msra.mxu0 %v1269_v11  ;;  %v1294_v6 = vld [vmem:[%s1670_s3 + $0x38] sm:$0xff] (!%p1035_p12)   ;;  %v1301_v10 = vld [vmem:[%s1672_s5 + $0x30] sm:$0xff] (!%p1035_p12)  }
  0x3c   : > { %1126 = vmatpush3.bf16.msra.mxu1 %v1270_v12  ;;  %1107 = vmatprep.subr.bf16.mxu0 %v1360_v5  ;;  %v1302_v11 = vld [vmem:[%s1672_s5 + $0x38] sm:$0xff] (!%p1035_p12)   ;;  %v706_v12 = vld [vmem:[%s1671_s4] sm:$0x1] (!%p1035_p12) }
  0x3d   : > { %1127 = vmatprep.subr.bf16.mxu1 %v1360_v5 }
  0x3f   : > { %1108 = vmatpush3.bf16.msra.mxu0 %v1271_v13 }
  0x40   : > { %1128 = vmatpush3.bf16.msra.mxu1 %v1272_v14  ;;  %1109 = vmatprep.subr.bf16.mxu0 %v1360_v5 }
  0x41   : > { %1129 = vmatprep.subr.bf16.mxu1 %v1360_v5 }
  0x43   : > { %1110 = vmatpush3.bf16.msra.mxu0 %v1273_v15 }
  0x44   : > { %1130 = vmatpush3.bf16.msra.mxu1 %v1274_v16  ;;  %1111 = vmatprep.subr.bf16.mxu0 %v1360_v5 }
  0x45   : > { %1131 = vmatprep.subr.bf16.mxu1 %v1360_v5 }
  0x47   : > { %1112 = vmatpush3.bf16.msra.mxu0 %v1275_v17 }
  0x48   : > { %1132 = vmatpush3.bf16.msra.mxu1 %v1276_v18  ;;  %1113 = vmatprep.subr.bf16.mxu0 %v1360_v5 }
  0x49   : > { %1133 = vmatprep.subr.bf16.mxu1 %v1360_v5 }
  0x4b   : > { %1114 = vmatpush3.bf16.msra.mxu0 %v1277_v19 }
  0x4c   : > { %1134 = vmatpush3.bf16.msra.mxu1 %v1278_v20  ;;  %1139 = vmatprep.subr.bf16.mxu0 %v1360_v5  ;;  %v813_v20 = vld [vmem:[%s1673_s6] sm:$0x1] (!%p1035_p12) }
  0x4d   : > { %1179 = vmatprep.subr.bf16.mxu1 (!%p1035_p12), %v1362_v58 }
  0x4e   : > { %1116 = vmatmul.mubr.bf16.vlgmr.msra.gmra.mrb[0].mxu0 %v976_v21 }
  0x4f   : > { %1136 = vmatmul.mubr.bf16.vlgmr.msra.gmra.mrb[0].mxu1 %v346_v23  ;;  %1140 = vmatpush3.bf16.msra.mxu0 %v1279_v22 }
  0x50   : > { %1141 = vmatprep.subr.bf16.mxu0 %v1360_v5  ;;  %1155 = vmatprep.mubr.msk.bf16.mxu0 %vm1361_vm0, %v1360_v5 }
  0x51   : > { %1195 = vmatprep.mubr.msk.bf16.mxu1 (!%p1035_p12), %vm1363_vm1, %v1362_v58  ;;  %1180 = vmatpush3.bf16.msra.mxu1 (!%p1035_p12), %v1295_v61 }
  0x52   : > { %1181 = vmatprep.subr.bf16.mxu1 (!%p1035_p12), %v1362_v58 }
  0x53   : > { %1142 = vmatpush3.bf16.msra.mxu0 %v1280_v24 }
  0x54   : > { %1143 = vmatprep.subr.bf16.mxu0 %v1360_v5 }
  0x55   : > { %1182 = vmatpush3.bf16.msra.mxu1 (!%p1035_p12), %v1296_v63 }
  0x56   : > { %1183 = vmatprep.subr.bf16.mxu1 (!%p1035_p12), %v1362_v58 }
  0x57   : > { %1144 = vmatpush3.bf16.msra.mxu0 %v1281_v25 }
  0x58   : > { %1145 = vmatprep.subr.bf16.mxu0 %v1360_v5 }
  0x59   : > { %1184 = vmatpush3.bf16.msra.mxu1 (!%p1035_p12), %v1297_v1 }
  0x5a   : > { %1185 = vmatprep.subr.bf16.mxu1 (!%p1035_p12), %v1362_v58 }
  0x5b   : > { %1146 = vmatpush3.bf16.msra.mxu0 %v1282_v26 }
  0x5c   : > { %1147 = vmatprep.subr.bf16.mxu0 %v1360_v5 }
  0x5d   : > { %1186 = vmatpush3.bf16.msra.mxu1 (!%p1035_p12), %v1298_v3 }
  0x5e   : > { %1187 = vmatprep.subr.bf16.mxu1 (!%p1035_p12), %v1362_v58 }
  0x5f   : > { %1148 = vmatpush3.bf16.msra.mxu0 %v1283_v27 }
  0x60   : > { %1149 = vmatprep.subr.bf16.mxu0 %v1360_v5 }
  0x63   : > { %1150 = vmatpush3.bf16.msra.mxu0 %v1284_v28 }
  0x64   : > { %1151 = vmatprep.subr.bf16.mxu0 %v1360_v5 }
  0x67   : > { %1152 = vmatpush3.bf16.msra.mxu0 %v1285_v29 }
  0x68   : > { %1153 = vmatprep.subr.bf16.mxu0 %v1360_v5  ;;  %v1299_v5 = vld [vmem:[%s1672_s5 + $0x20] sm:$0xff] (!%p1035_p12)  }
  0x69   : > { %1188 = vmatpush3.bf16.msra.mxu1 (!%p1035_p12), %v1299_v5 }
  0x6a   : > { %1189 = vmatprep.subr.bf16.mxu1 (!%p1035_p12), %v1362_v58 }
  0x6b   : > { %1154 = vmatpush3.bf16.msra.mxu0 %v1286_v30 }
  0x6c   : > { %1159 = vmatprep.subr.bf16.mxu0 (!%p1035_p12), %v1362_v58 }
  0x6d   : > { %1190 = vmatpush3.bf16.msra.mxu1 (!%p1035_p12), %v1300_v8 }
  0x6e   : > { %1156 = vmatmul.mubr.bf16.vlgmr.msra.gmra.mrb[4].mxu0 %v1009_v31  ;;  %1191 = vmatprep.subr.bf16.mxu1 (!%p1035_p12), %v1362_v58 }
  0x6f   : > { %1160 = vmatpush3.bf16.msra.mxu0 (!%p1035_p12), %v1287_v57  ;;  %1175 = vmatprep.mubr.msk.bf16.mxu0 (!%p1035_p12), %vm1363_vm1, %v1362_v58 }
  0x70   : > { %1161 = vmatprep.subr.bf16.mxu0 (!%p1035_p12), %v1362_v58 }
  0x71   : > { %1192 = vmatpush3.bf16.msra.mxu1 (!%p1035_p12), %v1301_v10 }
  0x72   : > { %1193 = vmatprep.subr.bf16.mxu1 (!%p1035_p12), %v1362_v58 }
  0x73   : > { %1162 = vmatpush3.bf16.msra.mxu0 (!%p1035_p12), %v1288_v59 }
  0x74   : > { %1163 = vmatprep.subr.bf16.mxu0 (!%p1035_p12), %v1362_v58 }
  0x75   : > { %1194 = vmatpush3.bf16.msra.mxu1 (!%p1035_p12), %v1302_v11 }
  0x77   : > { %1164 = vmatpush3.bf16.msra.mxu0 (!%p1035_p12), %v1289_v60 }
  0x78   : > { %1165 = vmatprep.subr.bf16.mxu0 (!%p1035_p12), %v1362_v58 }
  0x7b   : > { %1166 = vmatpush3.bf16.msra.mxu0 (!%p1035_p12), %v1290_v62 }
  0x7c   : > { %1167 = vmatprep.subr.bf16.mxu0 (!%p1035_p12), %v1362_v58 }
  0x7f   : > { %1168 = vmatpush3.bf16.msra.mxu0 (!%p1035_p12), %v1291_v0 }
  0x80   : > { %1169 = vmatprep.subr.bf16.mxu0 (!%p1035_p12), %v1362_v58 }
  0x83   : > { %1170 = vmatpush3.bf16.msra.mxu0 (!%p1035_p12), %v1292_v2 }
  0x84   : > { %1171 = vmatprep.subr.bf16.mxu0 (!%p1035_p12), %v1362_v58 }
  0x87   : > { %1172 = vmatpush3.bf16.msra.mxu0 (!%p1035_p12), %v1293_v4 }
  0x88   : > { %1173 = vmatprep.subr.bf16.mxu0 (!%p1035_p12), %v1362_v58 }
  0x8b   : > { %1174 = vmatpush3.bf16.msra.mxu0 (!%p1035_p12), %v1294_v6 }
 0x121   : > { %v464_v32 = vpop.f32.mrb[0].mxu0 }
 0x122   : > { %v1117_v33 = vpop.f32.mrb[1].mxu0  ;;  %v552_v34 = vpop.f32.mrb[0].mxu1 }
 0x123   : > { %v553_v35 = vadd.f32 %v552_v34, %v464_v32  ;;  %v467_v36 = vpop.f32.mrb[2].mxu0  ;;  %v1137_v37 = vpop.f32.mrb[1].mxu1 }
 0x124   : > { %v1118_v38 = vpop.f32.mrb[3].mxu0  ;;  %v555_v39 = vpop.f32.mrb[2].mxu1 }
 0x125   : > { %v1138_v40 = vpop.f32.mrb[3].mxu1 }
 0x141   : > { %v659_v41 = vpop.f32.mrb[4].mxu0 }
 0x142   : > { %v665_v43 = vadd.f32 %v659_v41, %v553_v35  ;;  %v1157_v44 = vpop.f32.mrb[5].mxu0 }
 0x143   : > { %v662_v45 = vpop.f32.mrb[6].mxu0 }
 0x144   : > { %v673_v46 = vadd.f32 %v1034_v42, %v665_v43  ;;  %v1158_v47 = vpop.f32.mrb[7].mxu0 }
 0x146   : > { %v674_v48 = vmax.f32 %v673_v46, 0.0 }
 0x148   : > { %v676_v49 = vrot.slane %v674_v48, 4 }
 0x14a   : > { %v677_v50 = vadd.f32 %v676_v49, %v674_v48 }
 0x14c   : > { %v678_v51 = vrot.slane %v677_v50, 2 }
 0x14e   : > { %v679_v52 = vadd.f32 %v678_v51, %v677_v50 }
 0x150   : > { %v680_v53 = vrot.slane %v679_v52, 1  ;;  %687 = sbr.rel (%p1035_p12) target bundleno = 785 (0x311), region = 97 }
 0x152   : > { %v681_v55 = vadd.f32 %v680_v53, %v679_v52 }
 0x154   : > { %v682_v56 = vadd.f32 %v681_v55, %v675_v54 }
 0x156   : > { %683 = vst [vmem:[#allocation2] sm:$0x1] %v682_v56 }
 0x15d   : > { %v688_v7 = vld [vmem:[#allocation2] sm:$0x1] }
 0x15e   : > { %v689_v9 = vpack.c.bf16 %v688_v7, %v688_v7 }
 0x160   : > { %1176 = vmatmul.mubr.bf16.vlgmr.msra.gmra.mrb[0].mxu0 %v689_v9 }
 0x233   : > { %v789_v13 = vpop.f32.mrb[0].mxu0 }
 0x234   : > { %v790_v14 = vadd.f32 %v789_v13, %v706_v12  ;;  %v1177_v15 = vpop.f32.mrb[1].mxu0 }
 0x235   : > { %v792_v16 = vpop.f32.mrb[2].mxu0 }
 0x236   : > { %v795_v17 = vmax.f32 %v790_v14, 0.0  ;;  %v1178_v18 = vpop.f32.mrb[3].mxu0 }
 0x238   : > { %v796_v19 = vpack.c.bf16 %v795_v17, %v795_v17 }
 0x23a   : > { %1196 = vmatmul.mubr.bf16.vlgmr.msra.gmra.mrb[0].mxu1 %v796_v19 }
 0x30d   : > { %v896_v21 = vpop.f32.mrb[0].mxu1 }
 0x30e   : > { %v897_v22 = vadd.f32 %v896_v21, %v813_v20  ;;  %v1197_v23 = vpop.f32.mrb[1].mxu1 }
 0x30f   : > { %v899_v24 = vpop.f32.mrb[2].mxu1 }
 0x310   : > { %902 = vst [vmem:[%s339_s15] sm:$0x1] %v897_v22  ;;  %v1198_v25 = vpop.f32.mrb[3].mxu1 }
 0x311 PF: > { %s17_s30 = sadd.s32 1, %s1357_s30   ;;  %s1675_s24 = smov %s1337_s25 }
 0x312   : > { %p14_p13 = scmp.ge.s32.totalorder %s17_s30, 6   ;;  %s1676_s25 = smov %s1455_s14 }
 0x313   : > { %s1677_s26 = smov %s1349_s28  ;;  %s1678_s27 = smov %s1353_s29 }
 0x314   : > { %s1679_s28 = smov %s1682_s8  ;;  %s1680_s29 = smov %s1686_s9 }
 0x315   :  { %16 = sbr.rel (!%p14_p13) target bundleno = 4 (0x4), region = 136 }

</bundles_post_ra>
